<compile_context>
chip_gen: v5e
topology: v5e:2x2
jax: 0.10.0
libtpu: 0.0.40
codegen_flags: <defaults>
</compile_context>

<pallas_src>
import jax
import jax.numpy as jnp
from jax.experimental import pallas as pl
from jax.experimental.pallas import tpu as pltpu

# Small shapes consistent with the module's forward pass.
B, S, D_MODEL, VOCAB = 2, 8, 32, 512


# ---------------------------------------------------------------------------
# Kernel body (shared by the grid-less and the row-tiled paths):
# fused matmul + bias + numerically-stable log-softmax over the last dim.
# ---------------------------------------------------------------------------
def projection_kernel(x_ref, w_ref, b_ref, out_ref):
    x = x_ref[...]                                   # (R, D)
    w = w_ref[...]                                   # (D, V)  (possibly bf16)
    if x.dtype != w.dtype:
        x = x.astype(w.dtype)                        # bf16 MXU operands path

    # MXU matmul, f32 accumulation; bias add in f32.
    logits = jnp.dot(x, w, preferred_element_type=jnp.float32)
    logits = logits + b_ref[...].astype(jnp.float32)  # (R, V)

    # log_softmax(z) = (z - max) - log(sum(exp(z - max)))   (all f32, VPU/EUP)
    m = jnp.max(logits, axis=-1, keepdims=True)
    shifted = logits - m
    lse = jnp.log(jnp.sum(jnp.exp(shifted), axis=-1, keepdims=True))
    out_ref[...] = (shifted - lse).astype(out_ref.dtype)


# ---------------------------------------------------------------------------
# Wrapper.
#   x: (B, S, D)   w: (D, V) pre-transposed   b: (1, V)
#   row_tile: if set and rows is a larger multiple of it, use a row-parallel
#             grid (128 on v5e, 256 on v6e/v7x); otherwise go grid-less.
# ---------------------------------------------------------------------------
def projection_layer(x, w, b, *, row_tile=None):
    bb, ss, d = x.shape
    v = w.shape[1]
    rows = bb * ss
    x2 = x.reshape(rows, d)                          # collapse batch+seq

    out_shape = jax.ShapeDtypeStruct((rows, v), jnp.float32)

    if row_tile is not None and rows > row_tile and rows % row_tile == 0:
        # Row-tiled, megacore-parallel path (for larger B*S).  Weight and bias
        # block indices are constant across the grid -> they stay resident in
        # VMEM and are DMA'd only once.
        out2 = pl.pallas_call(
            projection_kernel,
            out_shape=out_shape,
            grid=(rows // row_tile,),
            in_specs=[
                pl.BlockSpec((row_tile, d), lambda i: (i, 0)),   # activations
                pl.BlockSpec((d, v), lambda i: (0, 0)),          # weight
                pl.BlockSpec((1, v), lambda i: (0, 0)),          # bias
            ],
            out_specs=pl.BlockSpec((row_tile, v), lambda i: (i, 0)),
            compiler_params=pltpu.CompilerParams(
                dimension_semantics=("parallel",)),
        )(x2, w, b)
    else:
        # Grid-less path: whole arrays in VMEM, single DMA-in/compute/DMA-out.
        vmem_spec = pl.BlockSpec(memory_space=pltpu.MemorySpace.VMEM)
        out2 = pl.pallas_call(
            projection_kernel,
            out_shape=out_shape,
            in_specs=[vmem_spec, vmem_spec, vmem_spec],
            out_specs=vmem_spec,
        )(x2, w, b)

    # TODO(synk): for realistic vocab (32k-256k) this needs a vocab-tiled
    # online-logsumexp grid (flash-softmax style) — not needed at V=512.
    return out2.reshape(bb, ss, v)


# ---------------------------------------------------------------------------
# Pure-JAX reference (independent math path).
# ---------------------------------------------------------------------------
def projection_layer_ref(x, w, b):
    logits = jnp.einsum("bsd,dv->bsv", x, w) + b[0]
    return jax.nn.log_softmax(logits, axis=-1)


if __name__ == "__main__":
    key = jax.random.PRNGKey(0)
    kx, kw, kb, kx2 = jax.random.split(key, 4)

    x = jax.random.normal(kx, (B, S, D_MODEL), jnp.float32)
    w = 0.05 * jax.random.normal(kw, (D_MODEL, VOCAB), jnp.float32)
    b = 0.05 * jax.random.normal(kb, (1, VOCAB), jnp.float32)

    # 1) Grid-less f32 path at the module's small shapes.
    out = jax.block_until_ready(projection_layer(x, w, b))
    ref = projection_layer_ref(x, w, b)
    assert jnp.allclose(out, ref, atol=1e-5, rtol=1e-5), (
        f"max abs err = {float(jnp.max(jnp.abs(out - ref)))}")
    # log_softmax rows must (log-)normalize: logsumexp over vocab == 0.
    row_lse = jax.scipy.special.logsumexp(out, axis=-1)
    assert jnp.allclose(row_lse, 0.0, atol=1e-4), "rows not normalized"

    # 2) Row-tiled "parallel" path at a larger batch*seq (structure for
    #    v6e/v7x MXU-matched tiles; 256 rows -> grid=(2,) with 128-row tiles).
    x_big = jax.random.normal(kx2, (4, 64, D_MODEL), jnp.float32)
    out_big = jax.block_until_ready(projection_layer(x_big, w, b, row_tile=128))
    ref_big = projection_layer_ref(x_big, w, b)
    assert jnp.allclose(out_big, ref_big, atol=1e-5, rtol=1e-5), (
        f"tiled max abs err = {float(jnp.max(jnp.abs(out_big - ref_big)))}")

    # 3) bf16 MXU-operand path (weight passed as bf16, f32 accumulation and
    #    f32 softmax math) — looser tolerance is a test artifact, not a bug.
    out_bf16 = jax.block_until_ready(
        projection_layer(x, w.astype(jnp.bfloat16), b))
    assert jnp.allclose(out_bf16, ref, atol=2e-2, rtol=2e-2), (
        f"bf16 max abs err = {float(jnp.max(jnp.abs(out_bf16 - ref)))}")

    print("KERNEL_OK")
</pallas_src>

<mosaic_0001>
module attributes {stable_mosaic.version = 11 : i64} {
  func.func @projection_kernel(%arg0: memref<16x32xf32, #tpu.memory_space<vmem>>, %arg1: memref<32x512xf32, #tpu.memory_space<vmem>>, %arg2: memref<1x512xf32, #tpu.memory_space<vmem>>, %arg3: memref<16x512xf32, #tpu.memory_space<vmem>>) attributes {dimension_semantics = [], scalar_prefetch = 0 : i64, scratch_operands = 0 : i64, tpu.core_type = #tpu.core_type<tc>} {
    %c0 = arith.constant 0 : index
    %c0_0 = arith.constant 0 : index
    %0 = vector.load %arg0[%c0, %c0_0] : memref<16x32xf32, #tpu.memory_space<vmem>>, vector<16x32xf32>
    %c0_1 = arith.constant 0 : index
    %c0_2 = arith.constant 0 : index
    %1 = vector.load %arg1[%c0_1, %c0_2] : memref<32x512xf32, #tpu.memory_space<vmem>>, vector<32x512xf32>
    %cst = arith.constant dense<0.000000e+00> : vector<16x512xf32>
    %2 = tpu.matmul %0, %1, %cst {dimension_numbers = #tpu.dot_dimension_numbers<[1], [0], [0], [1], [0, 0, 1, 1], [], []>} : vector<16x32xf32>, vector<32x512xf32>, vector<16x512xf32> -> vector<16x512xf32>
    %c0_3 = arith.constant 0 : index
    %c0_4 = arith.constant 0 : index
    %3 = vector.load %arg2[%c0_3, %c0_4] : memref<1x512xf32, #tpu.memory_space<vmem>>, vector<1x512xf32>
    %4 = vector.broadcast %3 : vector<1x512xf32> to vector<16x512xf32>
    %5 = arith.addf %2, %4 : vector<16x512xf32>
    %cst_5 = arith.constant dense<0xFF800000> : vector<16xf32>
    %6 = vector.multi_reduction <maximumf>, %5, %cst_5 [1] : vector<16x512xf32> to vector<16xf32>
    %7 = vector.shape_cast %6 : vector<16xf32> to vector<16x1xf32>
    %8 = vector.broadcast %7 : vector<16x1xf32> to vector<16x512xf32>
    %9 = arith.subf %5, %8 : vector<16x512xf32>
    %10 = math.exp %9 : vector<16x512xf32>
    %cst_6 = arith.constant dense<0.000000e+00> : vector<16xf32>
    %11 = vector.multi_reduction <add>, %10, %cst_6 [1] : vector<16x512xf32> to vector<16xf32>
    %12 = vector.shape_cast %11 : vector<16xf32> to vector<16x1xf32>
    %13 = math.log %12 : vector<16x1xf32>
    %14 = vector.broadcast %13 : vector<16x1xf32> to vector<16x512xf32>
    %15 = arith.subf %9, %14 : vector<16x512xf32>
    %c0_7 = arith.constant 0 : index
    %c0_8 = arith.constant 0 : index
    %16 = vector.load %arg3[%c0_7, %c0_8] : memref<16x512xf32, #tpu.memory_space<vmem>>, vector<16x512xf32>
    tpu.vector_store %arg3[%c0_7, %c0_8], %15 {strides = array<i32>} : memref<16x512xf32, #tpu.memory_space<vmem>>, vector<16x512xf32>,
    return
  }
}

</mosaic_0001>

<bundles_post_ra>
// kernel: tpu_custom_call.1
= control target key start
LH: loop header
LB: loop body
LE: loop exit
PB: predicated region body
PF: predicated region fallthrough
CT: control target
= control target key end

     0   :  { %8 = vsyncpa [#allocation3], 0  ;;  %s463_s0 = inlined_call_operand.hbm [shape: f32[16,32], index: 0, kind: input, shape index: {}]   ;;  %s464_s1 = inlined_call_operand.hbm [shape: f32[32,512], index: 1, kind: input, shape index: {}]   ;;  %s465_s2 = inlined_call_operand.hbm [shape: f32[1,512], index: 2, kind: input, shape index: {}]   ;;  %s466_s3 = inlined_call_operand.hbm [shape: f32[16,512], index: 3, kind: output, shape index: {}]  }
   0x1   :  { %9 = vsyncpa [#allocation6], 0  ;;  %s28_s14 = sshll.u32 %s464_s1, 4  ;;  %s29_s14 = int_to_ptr.hbm [resolvable:$true] %s28_s14 }
   0x2   :  { %10 = vsyncpa [#allocation4], 0  ;;  %s409_s15 = smov [#allocation5]   ;;  %s15_s19 = sshll.u32 %s463_s0, 4  ;;  %s16_s19 = int_to_ptr.hbm [resolvable:$true] %s15_s19 }
   0x3   :  { %s30_s16 = sshll.u32 %s409_s15, 4  ;;  %s410_s20 = smov 512   ;;  %s31_s16 = int_to_ptr.vmem [resolvable:$true] %s30_s16 }
   0x4   :  { %s411_s21 = smov 32   ;;  %s412_s22 = smov [#allocation2]  }
   0x5   :  { %36 = dma.hbm_to_vmem [thread:$0]  %s29_s14, 2048, %s31_s16, [#allocation6], %s410_s20, %s410_s20, %s411_s21  }
   0x6   :  { %s17_s23 = sshll.u32 %s412_s22, 4  ;;  %s413_s1 = smov 128   ;;  %s18_s23 = int_to_ptr.vmem [resolvable:$true] %s17_s23 }
   0x7   :  { %s414_s24 = smov 8   ;;  %s42_s27 = sshll.u32 %s465_s2, 4  ;;  %s43_s27 = int_to_ptr.hbm [resolvable:$true] %s42_s27 }
   0x8   :  { %23 = dma.hbm_to_vmem [thread:$0]  %s16_s19, 256, %s18_s23, [#allocation3], %s413_s1, %s413_s1, %s414_s24  }
   0x9   :  { %s415_s28 = smov [#allocation7]  }
   0xa   :  { %s44_s0 = sshll.u32 %s415_s28, 4  ;;  %s45_s0 = int_to_ptr.vmem [resolvable:$true] %s44_s0 }
   0xb   :  { %47 = dma.hbm_to_vmem [thread:$0]  %s43_s27, 64, %s45_s0, [#allocation6]  }
   0xc   :  { %403 = dma.done.wait [#allocation3], 256  }
   0xd   :  { %404 = vsyncadd [#allocation3], 4294967040 }
   0xe   :  { %405 = dma.done.wait [#allocation6], 2112  }
   0xf   :  { %406 = vsyncadd [#allocation6], 4294965184  ;;  %v76_v0 = vld [vmem:[#allocation5 + $0x70] sm:$0xff]  ;;  %v77_v1 = vld [vmem:[#allocation5 + $0x78] sm:$0xff]  ;;  %vm88_vm0 = vcmask 261120   ;;  %s416_s2 = smov [#allocation8]  }
  0x10   :  { %v72_v2 = vld [vmem:[#allocation5 + $0x50] sm:$0xff]  ;;  %153 = vmatpush.msra.mxu2 %v76_v0  ;;  %176 = vmatpush.msra.mxu3 %v77_v1  ;;  %v73_v3 = vld [vmem:[#allocation5 + $0x58] sm:$0xff]  ;;  %v74_v6 = vld [vmem:[#allocation5 + $0x60] sm:$0xff]  ;;  %s255_s29 = sshll.u32 %s416_s2, 4  ;;  %s257_s5 = sshll.u32 %s466_s3, 4  ;;  %s256_s29 = int_to_ptr.vmem [resolvable:$true] %s255_s29  ;;  %s258_s5 = int_to_ptr.hbm [resolvable:$true] %s257_s5 }
  0x11   :  { %v68_v4 = vld [vmem:[#allocation5 + $0x30] sm:$0xff]  ;;  %v69_v5 = vld [vmem:[#allocation5 + $0x38] sm:$0xff]  ;;  %v75_v7 = vld [vmem:[#allocation5 + $0x68] sm:$0xff]  ;;  %107 = vmatpush.msra.mxu0 %v74_v6 }
  0x12   :  { %154 = vmatpush.msra.mxu2 %v72_v2  ;;  %177 = vmatpush.msra.mxu3 %v73_v3  ;;  %v70_v8 = vld [vmem:[#allocation5 + $0x40] sm:$0xff]  ;;  %v64_v9 = vld [vmem:[#allocation5 + $0x10] sm:$0xff]  ;;  %v65_v10 = vld [vmem:[#allocation5 + $0x18] sm:$0xff] }
  0x13   :  { %130 = vmatpush.msra.mxu1 %v75_v7  ;;  %v71_v11 = vld [vmem:[#allocation5 + $0x48] sm:$0xff]  ;;  %v60_v12 = vld [vmem:[#allocation2] sm:$0xff]  ;;  %108 = vmatpush.msra.mxu0 %v70_v8  ;;  %v66_v13 = vld [vmem:[#allocation5 + $0x20] sm:$0xff] }
  0x14   :  { %155 = vmatpush.msra.mxu2 %v68_v4  ;;  %178 = vmatpush.msra.mxu3 %v69_v5  ;;  %v67_v14 = vld [vmem:[#allocation5 + $0x28] sm:$0xff]  ;;  %v62_v15 = vld [vmem:[#allocation5] sm:$0xff]  ;;  %v61_v17 = vld [vmem:[#allocation2 + $0x8] sm:$0xff] }
  0x15   :  { %131 = vmatpush.msra.mxu1 %v71_v11  ;;  %v63_v16 = vld [vmem:[#allocation5 + $0x8] sm:$0xff]  ;;  %109 = vmatpush.msra.mxu0 %v66_v13  ;;  %v78_v18 = vld [vmem:[#allocation7] sm:$0xf] }
  0x16   :  { %156 = vmatpush.msra.mxu2 %v64_v9  ;;  %179 = vmatpush.msra.mxu3 %v65_v10  ;;  %v80_v19 = vperm.slane %v78_v18, 0  ;;  %v81_v20 = vperm.slane %v78_v18, 1  ;;  %v82_v21 = vperm.slane %v78_v18, 2  ;;  %v83_v22 = vperm.slane %v78_v18, 3 }
  0x17   :  { %275 = vmatmul.msk.f32.vlgmr.msra.gmra.mxu2 %vm88_vm0, %v60_v12  ;;  %277 = vmatmul.msk.f32.vlgmr.msra.gmra.mxu3 %vm88_vm0, %v60_v12 }
  0x18   :  { %132 = vmatpush.msra.mxu1 %v67_v14  ;;  %110 = vmatpush.msra.mxu0 %v62_v15 }
  0x19   :  { %271 = vmatmul.msk.f32.vlgmr.msra.gmra.mxu0 %vm88_vm0, %v60_v12 }
  0x1a   :  { %133 = vmatpush.msra.mxu1 %v63_v16 }
  0x1b   :  { %273 = vmatmul.msk.f32.vlgmr.msra.gmra.mxu1 %vm88_vm0, %v60_v12 }
  0x1f   :  { %276 = vmatmul.msk.f32.gmra.mxu2 %vm88_vm0, %v61_v17  ;;  %278 = vmatmul.msk.f32.gmra.mxu3 %vm88_vm0, %v61_v17 }
  0x21   :  { %272 = vmatmul.msk.f32.gmra.mxu0 %vm88_vm0, %v61_v17 }
  0x23   :  { %274 = vmatmul.msk.f32.gmra.mxu1 %vm88_vm0, %v61_v17 }
  0x96   :  { %v112_v23 = vpop.f32.mrf.mxu0 }
  0x97   :  { %v113_v25 = vadd.f32 %v112_v23, %v80_v19 }
  0x98   :  { %v135_v24 = vpop.f32.mrf.mxu1 }
  0x99   :  { %v136_v26 = vadd.f32 %v135_v24, %v81_v20 }
  0x9a   :  { %v158_v27 = vpop.f32.mrf.mxu2  ;;  %v181_v28 = vpop.f32.mrf.mxu3 }
  0x9b   :  { %v159_v29 = vadd.f32 %v158_v27, %v82_v21  ;;  %v182_v30 = vadd.f32 %v181_v28, %v83_v22 }
  0x9d   :  { %v187_v31 = vmax.f32 %v113_v25, %v159_v29  ;;  %v188_v32 = vmax.f32 %v136_v26, %v182_v30 }
  0x9e   :  { %v115_v34 = vpop.f32.mrf.mxu0 }
  0x9f   :  { %v189_v33 = vmax.f32 %v187_v31, %v188_v32  ;;  %v116_v36 = vadd.f32 %v115_v34, %v80_v19 }
  0xa0   :  { %v138_v35 = vpop.f32.mrf.mxu1 }
  0xa1   :  { %190 = vmax.xlane.f32.xlu0 %v189_v33  ;;  %v139_v37 = vadd.f32 %v138_v35, %v81_v20 }
  0xa2   :  { %v161_v38 = vpop.f32.mrf.mxu2  ;;  %v184_v39 = vpop.f32.mrf.mxu3 }
  0xa3   :  { %v162_v40 = vadd.f32 %v161_v38, %v82_v21  ;;  %v185_v41 = vadd.f32 %v184_v39, %v83_v22 }
  0xa5   :  { %v192_v42 = vmax.f32 %v116_v36, %v162_v40  ;;  %v193_v43 = vmax.f32 %v139_v37, %v185_v41 }
  0xa7   :  { %v194_v44 = vmax.f32 %v192_v42, %v193_v43 }
  0xa9   :  { %195 = vmax.xlane.f32.xlu0 %v194_v44 }
 0x114   :  { %v191_v45 = vpop.xlane.xlu0 %190 }
 0x115   :  { %v197_v46 = vsub.f32 %v113_v25, %v191_v45  ;;  %v198_v47 = vsub.f32 %v136_v26, %v191_v45  ;;  %v199_v48 = vsub.f32 %v159_v29, %v191_v45  ;;  %v200_v49 = vsub.f32 %v182_v30, %v191_v45 }
 0x117   :  { %v205_v50 = vmul.f32 1.442695, %v197_v46  ;;  %v207_v51 = vmul.f32 1.442695, %v198_v47  ;;  %v209_v52 = vmul.f32 1.442695, %v199_v48 }
 0x118   :  { %v211_v53 = vmul.f32 1.442695, %v200_v49 }
 0x119   :  { %287 = vpow2.f32 %v205_v50 }
 0x11a   :  { %289 = vpow2.f32 %v207_v51 }
 0x11b   :  { %291 = vpow2.f32 %v209_v52 }
 0x11c   :  { %v196_v54 = vpop.xlane.xlu0 %195  ;;  %293 = vpow2.f32 %v211_v53 }
 0x11d   :  { %v201_v55 = vsub.f32 %v116_v36, %v196_v54  ;;  %v202_v56 = vsub.f32 %v139_v37, %v196_v54  ;;  %v203_v57 = vsub.f32 %v162_v40, %v196_v54  ;;  %v204_v58 = vsub.f32 %v185_v41, %v196_v54 }
 0x11f   :  { %v288_v59 = vpop.eup %287  ;;  %v213_v60 = vmul.f32 1.442695, %v201_v55  ;;  %v215_v61 = vmul.f32 1.442695, %v202_v56  ;;  %v217_v63 = vmul.f32 1.442695, %v203_v57 }
 0x120   :  { %v290_v62 = vpop.eup %289  ;;  %v219_v2 = vmul.f32 1.442695, %v204_v58 }
 0x121   :  { %295 = vpow2.f32 %v213_v60  ;;  %v221_v0 = vadd.f32 %v290_v62, %v288_v59  ;;  %v292_v1 = vpop.eup %291 }
 0x122   :  { %297 = vpow2.f32 %v215_v61  ;;  %v294_v4 = vpop.eup %293 }
 0x123   :  { %v222_v3 = vadd.f32 %v292_v1, %v221_v0  ;;  %299 = vpow2.f32 %v217_v63 }
 0x124   :  { %301 = vpow2.f32 %v219_v2 }
 0x125   :  { %v223_v5 = vadd.f32 %v294_v4, %v222_v3 }
 0x127   :  { %v296_v6 = vpop.eup %295  ;;  %224 = vadd.xlane.f32.xlu1 %v223_v5 }
 0x128   :  { %v298_v7 = vpop.eup %297 }
 0x129   :  { %v226_v8 = vadd.f32 %v298_v7, %v296_v6  ;;  %v300_v9 = vpop.eup %299 }
 0x12a   :  { %v302_v11 = vpop.eup %301 }
 0x12b   :  { %v227_v10 = vadd.f32 %v300_v9, %v226_v8 }
 0x12d   :  { %v228_v12 = vadd.f32 %v302_v11, %v227_v10 }
 0x12f   :  { %229 = vadd.xlane.f32.xlu1 %v228_v12 }
 0x19a   :  { %v225_v13 = vpop.xlane.xlu1 %224 }
 0x19b   :  { %303 = vlog2.f32 %v225_v13 }
 0x1a1   :  { %v304_v14 = vpop.eup %303 }
 0x1a2   :  { %v232_v15 = vmul.f32 0.6931472, %v304_v14  ;;  %v230_v16 = vpop.xlane.xlu1 %229 }
 0x1a3   :  { %305 = vlog2.f32 %v230_v16 }
 0x1a4   :  { %v235_v17 = vsub.f32 %v197_v46, %v232_v15  ;;  %v236_v18 = vsub.f32 %v198_v47, %v232_v15  ;;  %v237_v19 = vsub.f32 %v199_v48, %v232_v15  ;;  %v238_v20 = vsub.f32 %v200_v49, %v232_v15 }
 0x1a6   :  { %243 = vst [vmem:[#allocation8] sm:$0xff] %v235_v17 }
 0x1a7   :  { %244 = vst [vmem:[#allocation8 + $0x8] sm:$0xff] %v236_v18 }
 0x1a8   :  { %245 = vst [vmem:[#allocation8 + $0x10] sm:$0xff] %v237_v19 }
 0x1a9   :  { %v306_v21 = vpop.eup %305  ;;  %246 = vst [vmem:[#allocation8 + $0x18] sm:$0xff] %v238_v20 }
 0x1aa   :  { %v234_v22 = vmul.f32 0.6931472, %v306_v21 }
 0x1ac   :  { %v239_v23 = vsub.f32 %v201_v55, %v234_v22  ;;  %v240_v24 = vsub.f32 %v202_v56, %v234_v22  ;;  %v241_v25 = vsub.f32 %v203_v57, %v234_v22  ;;  %v242_v26 = vsub.f32 %v204_v58, %v234_v22 }
 0x1ae   :  { %247 = vst [vmem:[#allocation8 + $0x20] sm:$0xff] %v239_v23 }
 0x1af   :  { %248 = vst [vmem:[#allocation8 + $0x28] sm:$0xff] %v240_v24 }
 0x1b0   :  { %249 = vst [vmem:[#allocation8 + $0x30] sm:$0xff] %v241_v25 }
 0x1b1   :  { %250 = vst [vmem:[#allocation8 + $0x38] sm:$0xff] %v242_v26 }
 0x1b2   :  { %263 = dma.vmem_to_hbm [thread:$0]  %s256_s29, 1024, %s258_s5, [#allocation4], %s410_s20, %s410_s20, %s411_s21  }
 0x1b3   :  { %407 = dma.done.wait [#allocation4], 1024  }
 0x1b4   :  { %408 = vsyncadd [#allocation4], 4294966272 }
 0x1b5   :  { %268 = vsyncpa [#allocation3], 1 }
 0x1b6   :  { %269 = vsyncpa [#allocation6], 1 }
 0x1b7   :  { %270 = vsyncpa [#allocation4], 1 }

</bundles_post_ra>
